<compile_context>
chip_gen: v7x
topology: tpu7x:2x2x1
jax: 0.10.0
libtpu: 0.0.40
codegen_flags: <defaults>
</compile_context>

<pallas_src>
import math

import numpy as np
import jax
import jax.numpy as jnp
from jax.experimental import pallas as pl
from jax.experimental.pallas import tpu as pltpu


# ----------------------------------------------------------------------------
# Pallas dense (nn.Linear) kernel:  y = x @ W + b   (W = torch_weight.T)
# Row-tiled over M so big [N*Len_in, C] projections stream through VMEM.
# ----------------------------------------------------------------------------
def _dense_kernel(x_ref, w_ref, b_ref, o_ref):
    o_ref[...] = (jnp.dot(x_ref[...], w_ref[...], preferred_element_type=jnp.float32)
                  + b_ref[...]).astype(o_ref.dtype)


def dense(x, w, b, block_rows=1024, out_dtype=None):
    """x: [M, K], w: [K, Nout], b: [1, Nout] -> [M, Nout] (optionally cast to out_dtype)."""
    M, K = x.shape
    Nout = w.shape[1]
    out_dtype = x.dtype if out_dtype is None else out_dtype
    tm = min(block_rows, M)                 # tm == M (full) or a multiple of 8
    grid_m = pl.cdiv(M, tm)
    return pl.pallas_call(
        _dense_kernel,
        out_shape=jax.ShapeDtypeStruct((M, Nout), out_dtype),
        grid=(grid_m,),
        in_specs=[pl.BlockSpec((tm, K), lambda i: (i, 0)),
                  pl.BlockSpec((K, Nout), lambda i: (0, 0)),
                  pl.BlockSpec((1, Nout), lambda i: (0, 0))],
        out_specs=pl.BlockSpec((tm, Nout), lambda i: (i, 0)),
        compiler_params=pltpu.CompilerParams(
            dimension_semantics=("parallel",),
            vmem_limit_bytes=64 * 1024 * 1024),
    )(x, w, b)


# ----------------------------------------------------------------------------
# Core MS-deform-attn sampling kernel (equivalent of MSDeformAttnFunction.apply)
#   value : [N, Len_in, C]   (mxu_dtype; VMEM-resident across the q-tile axis)
#   loc3  : [N, Lq, 3*LHP]   lane-dense x|y|t slabs, columns ordered (level, head, point)
#   attn  : [N, Lq, LHP]     same column ordering
#   out   : [N, Lq, C]       f32
# Grid = (batch, q_tile). Spatial shapes / level starts are static Python values,
# baked into the kernel as scalars (no captured array constants).
# ----------------------------------------------------------------------------
def _make_msda_core_kernel(spatial_shapes, level_start, n_frames,
                           n_heads, n_levels, n_points, d_head, tq,
                           mxu_dtype, k_chunk):
    H, L, P = n_heads, n_levels, n_points
    HP = H * P
    LHP = L * H * P
    level_len = [n_frames * h * w for (h, w) in spatial_shapes]
    level_base = [n_frames * s for s in level_start]

    def kernel(val_ref, loc_ref, attn_ref, out_ref):
        loc = loc_ref[0]       # [tq, 3*LHP]
        attn = attn_ref[0]     # [tq, LHP]

        # Per-head f32 accumulators; one lane-dense store at the end.
        acc = [jnp.zeros((tq, d_head), jnp.float32) for _ in range(H)]

        for l in range(L):
            Hl, Wl = spatial_shapes[l]
            llen = level_len[l]
            lbase = level_base[l]
            c0 = l * HP

            # ---- lane-dense corner math for all (head, point) samples of this level ----
            xs = loc[:, c0:c0 + HP] * float(Wl) - 0.5                      # [tq, HP]
            ys = loc[:, LHP + c0:LHP + c0 + HP] * float(Hl) - 0.5
            ts = loc[:, 2 * LHP + c0:2 * LHP + c0 + HP]
            # TODO(synk): the CUDA kernel's behaviour for t outside [0, T-1] is unspecified;
            # we clamp to the valid frame range (matches the JAX reference).
            t_idx = (jnp.clip(ts, 0.0, float(n_frames - 1)) + 0.5).astype(jnp.int32)
            aw = attn[:, c0:c0 + HP]
            x0 = jnp.floor(xs)
            y0 = jnp.floor(ys)
            dx = xs - x0
            dy = ys - y0
            x0i = x0.astype(jnp.int32)
            y0i = y0.astype(jnp.int32)
            t_off = t_idx * (Hl * Wl)                                       # [tq, HP]

            corner_w = []
            corner_idx = []
            for ox, oy, cw in ((0, 0, (1.0 - dx) * (1.0 - dy)),
                               (1, 0, dx * (1.0 - dy)),
                               (0, 1, (1.0 - dx) * dy),
                               (1, 1, dx * dy)):
                cx = x0i + ox
                cy = y0i + oy
                valid = ((cx >= 0) & (cx < Wl) & (cy >= 0) & (cy < Hl)).astype(jnp.float32)
                corner_w.append(cw * aw * valid)                            # [tq, HP]
                corner_idx.append(t_off + jnp.clip(cy, 0, Hl - 1) * Wl
                                  + jnp.clip(cx, 0, Wl - 1))                # within-level idx

            # ---- K-chunked one-hot contraction on the MXU ----
            # TODO(synk): for very large Len_in, the real structural win is a
            # scalar-prefetch / manual-DMA gather of only the H*L*P*4 needed value rows
            # per query tile (value in memory_space=pl.ANY), which also removes the
            # value-resident-in-VMEM requirement (v7x 64 MiB).
            for cs in range(0, llen, k_chunk):
                csz = min(k_chunk, llen - cs)
                iota = jax.lax.broadcasted_iota(jnp.int32, (1, csz), 1) + cs
                for h in range(H):
                    A = jnp.zeros((tq, csz), jnp.float32)
                    for p in range(P):
                        col = h * P + p
                        for c in range(4):
                            A = A + jnp.where(iota == corner_idx[c][:, col:col + 1],
                                              corner_w[c][:, col:col + 1], 0.0)
                    # point-of-use ref slice: only one [csz, d_head] value slab live
                    vl = val_ref[0, lbase + cs:lbase + cs + csz,
                                 h * d_head:(h + 1) * d_head]
                    acc[h] = acc[h] + jnp.dot(A.astype(mxu_dtype), vl,
                                              preferred_element_type=jnp.float32)

        # single lane-dense full-width store (avoids H masked d_head-wide stores)
        out_ref[0] = jnp.concatenate(acc, axis=-1).astype(out_ref.dtype)

    return kernel


def msda_core_pallas(value, loc_x, loc_y, loc_t, attn, spatial_shapes, level_start,
                     n_frames, n_heads, n_levels, n_points, d_head, tq=128,
                     mxu_dtype=jnp.bfloat16, k_chunk=2048):
    """value [N,Len_in,C]; loc_*/attn [N,Lq,L,H,P] -> [N,Lq,C] (f32)."""
    N, Len_in, C = value.shape
    Lq = loc_x.shape[1]
    LHP = n_levels * n_heads * n_points

    value = value.astype(mxu_dtype)   # no-op if already emitted in mxu_dtype
    loc3 = jnp.concatenate([loc_x.reshape(N, Lq, LHP),
                            loc_y.reshape(N, Lq, LHP),
                            loc_t.reshape(N, Lq, LHP)], axis=-1).astype(jnp.float32)
    attn2 = attn.reshape(N, Lq, LHP).astype(jnp.float32)

    TQ = min(tq, Lq)
    grid_q = pl.cdiv(Lq, TQ)
    kernel = _make_msda_core_kernel(spatial_shapes, level_start, n_frames,
                                    n_heads, n_levels, n_points, d_head, TQ,
                                    mxu_dtype, k_chunk)
    # TODO(synk): on v7x (64 MiB VMEM), if Len_in*C*2B still doesn't fit with headroom,
    # add a head grid axis (value block (1, Len_in, d_head)) or pipeline_mode=pl.Buffered(1)
    # on the value spec; kept single-spec here for portability.
    return pl.pallas_call(
        kernel,
        out_shape=jax.ShapeDtypeStruct((N, Lq, C), jnp.float32),
        grid=(N, grid_q),
        in_specs=[pl.BlockSpec((1, Len_in, C), lambda n, q: (n, 0, 0)),
                  pl.BlockSpec((1, TQ, 3 * LHP), lambda n, q: (n, q, 0)),
                  pl.BlockSpec((1, TQ, LHP), lambda n, q: (n, q, 0))],
        out_specs=pl.BlockSpec((1, TQ, C), lambda n, q: (n, q, 0)),
        compiler_params=pltpu.CompilerParams(
            dimension_semantics=("parallel", "parallel"),
            vmem_limit_bytes=64 * 1024 * 1024),
    )(value, loc3, attn2)


# ----------------------------------------------------------------------------
# Pure-JAX reference of the core op (gather-based) for validation.
# ----------------------------------------------------------------------------
def msda_core_ref(value, loc_x, loc_y, loc_t, attn, spatial_shapes, level_start,
                  n_frames, n_heads, n_levels, n_points, d_head):
    N, Len_in, C = value.shape
    Lq = loc_x.shape[1]
    v = value.astype(jnp.float32).reshape(N, Len_in, n_heads, d_head)
    out = jnp.zeros((N, Lq, n_heads, d_head), jnp.float32)
    for l, (Hl, Wl) in enumerate(spatial_shapes):
        base = level_start[l] * n_frames
        for p in range(n_points):
            x = loc_x[:, :, l, :, p] * Wl - 0.5        # [N, Lq, H]
            y = loc_y[:, :, l, :, p] * Hl - 0.5
            t = loc_t[:, :, l, :, p]
            t_idx = (jnp.clip(t, 0.0, float(n_frames - 1)) + 0.5).astype(jnp.int32)
            aw = attn[:, :, l, :, p]
            x0 = jnp.floor(x)
            y0 = jnp.floor(y)
            dx = x - x0
            dy = y - y0
            x0i = x0.astype(jnp.int32)
            y0i = y0.astype(jnp.int32)
            for cx, cy, cw in ((x0i, y0i, (1 - dx) * (1 - dy)),
                               (x0i + 1, y0i, dx * (1 - dy)),
                               (x0i, y0i + 1, (1 - dx) * dy),
                               (x0i + 1, y0i + 1, dx * dy)):
                valid = (cx >= 0) & (cx < Wl) & (cy >= 0) & (cy < Hl)
                w = jnp.where(valid, cw * aw, 0.0)                          # [N, Lq, H]
                idx = base + t_idx * (Hl * Wl) + jnp.clip(cy, 0, Hl - 1) * Wl \
                      + jnp.clip(cx, 0, Wl - 1)                             # [N, Lq, H]
                idxb = jnp.broadcast_to(idx[:, :, :, None],
                                        (N, Lq, n_heads, d_head))
                g = jnp.take_along_axis(v, idxb, axis=1)                    # [N,Lq,H,Dh]
                out = out + w[..., None] * g
    return out.reshape(N, Lq, C)


# ----------------------------------------------------------------------------
# Parameter init reproducing MSDeformAttn._reset_parameters deterministically.
# The three query-side projections are fused and their columns PERMUTED at init
# into [x(LHP) | y(LHP) | t(LHP) | attn(LHP)] with (level, head, point) ordering,
# so the kernel's lane-dense layout falls straight out of the matmul.
# ----------------------------------------------------------------------------
def init_params(key, d_model, n_frames, n_levels, n_heads, n_points):
    H, L, P = n_heads, n_levels, n_points
    LHP = L * H * P
    thetas = jnp.arange(H, dtype=jnp.float32) * (2.0 * math.pi / H)
    grid = jnp.stack([jnp.cos(thetas), jnp.sin(thetas)], -1)             # [H, 2]
    grid = grid / jnp.max(jnp.abs(grid), axis=-1, keepdims=True)
    grid = jnp.tile(grid[:, None, None, :], (1, L, P, 1))                # [H, L, P, 2]
    grid = grid * jnp.arange(1, P + 1, dtype=jnp.float32)[None, None, :, None]
    time_init = jnp.tile(jnp.linspace(0.0, 1.0, P, dtype=jnp.float32)[None, None, :],
                         (H, L, 1))                                      # [H, L, P]
    grid_lhp = jnp.transpose(grid, (1, 0, 2, 3))                         # [L, H, P, 2]
    time_lhp = jnp.transpose(time_init, (1, 0, 2))                       # [L, H, P]
    query_b = jnp.concatenate([grid_lhp[..., 0].reshape(1, LHP),
                               grid_lhp[..., 1].reshape(1, LHP),
                               time_lhp.reshape(1, LHP),
                               jnp.zeros((1, LHP), jnp.float32)], axis=1)

    def xavier(k, fan_in, fan_out):
        a = math.sqrt(6.0 / (fan_in + fan_out))
        return jax.random.uniform(k, (fan_in, fan_out), jnp.float32, -a, a)

    k1, k2 = jax.random.split(key)
    return dict(
        # sampling_offsets / time_offsets / attention_weights all have zero weights.
        query_w=jnp.zeros((d_model, 4 * LHP), jnp.float32),
        query_b=query_b,
        value_w=xavier(k1, d_model, d_model),
        value_b=jnp.zeros((1, d_model), jnp.float32),
        out_w=xavier(k2, d_model, d_model),
        out_b=jnp.zeros((1, d_model), jnp.float32),
    )


# ----------------------------------------------------------------------------
# Full forward pass.
# ----------------------------------------------------------------------------
def ms_deform_attn_forward(params, query, reference_points, input_flatten,
                           spatial_shapes, n_frames, n_levels, n_heads, n_points,
                           input_padding_mask=None, core_impl="pallas",
                           mxu_dtype=jnp.bfloat16, tq=128):
    N, Lq, C = query.shape
    _, Len_in, _ = input_flatten.shape
    d_head = C // n_heads
    H, L, P = n_heads, n_levels, n_points
    LHP = L * H * P
    level_start = [0]
    for (Hl, Wl) in spatial_shapes[:-1]:
        level_start.append(level_start[-1] + Hl * Wl)
    assert sum(Hl * Wl for Hl, Wl in spatial_shapes) * n_frames == Len_in

    # value projection (tiled Pallas matmul), emitted directly in the core-kernel dtype
    value_dtype = mxu_dtype if core_impl == "pallas" else jnp.float32
    value = dense(input_flatten.reshape(N * Len_in, C),
                  params['value_w'], params['value_b'],
                  out_dtype=value_dtype).reshape(N, Len_in, C)
    if input_padding_mask is not None:
        value = jnp.where(input_padding_mask[..., None],
                          jnp.zeros((), value.dtype), value)

    # fused sampling/time/attention projections (one tiled Pallas matmul),
    # columns already in (level, head, point) x|y|t|attn layout.
    mixed = dense(query.reshape(N * Lq, C), params['query_w'], params['query_b'])
    x_off = mixed[:, 0 * LHP:1 * LHP].reshape(N, Lq, L, H, P)
    y_off = mixed[:, 1 * LHP:2 * LHP].reshape(N, Lq, L, H, P)
    t_off = mixed[:, 2 * LHP:3 * LHP].reshape(N, Lq, L, H, P)
    a_raw = mixed[:, 3 * LHP:4 * LHP].reshape(N, Lq, L, H, P)

    def softmax_lp(z):          # softmax over (level, point) jointly, per head
        m = jnp.max(z, axis=(2, 4), keepdims=True)
        e = jnp.exp(z - m)
        return e / jnp.sum(e, axis=(2, 4), keepdims=True)

    t_soft = softmax_lp(t_off)
    attn = softmax_lp(a_raw)

    if reference_points.shape[-1] != 3:
        # TODO(synk): 2-/4-dim reference_points (purely spatial) paths not wired to the
        # temporal kernel; only the (x, y, t) path of this module is implemented.
        raise NotImplementedError("only reference_points[...,-1] == 3 is supported")

    W_arr = jnp.asarray([w for (_, w) in spatial_shapes],
                        jnp.float32).reshape(1, 1, L, 1, 1)
    H_arr = jnp.asarray([h for (h, _) in spatial_shapes],
                        jnp.float32).reshape(1, 1, L, 1, 1)
    rx = reference_points[:, :, :, 0][:, :, :, None, None]
    ry = reference_points[:, :, :, 1][:, :, :, None, None]
    rt = reference_points[:, :, :, 2][:, :, :, None, None]
    loc_x = rx + x_off / W_arr
    loc_y = ry + y_off / H_arr
    loc_t = jnp.round((rt + t_soft) * (n_frames - 1))     # set_frame_index

    if core_impl == "pallas":
        out = msda_core_pallas(value, loc_x, loc_y, loc_t, attn, spatial_shapes,
                               level_start, n_frames, H, L, P, d_head,
                               tq=tq, mxu_dtype=mxu_dtype)
    else:
        out = msda_core_ref(value, loc_x, loc_y, loc_t, attn, spatial_shapes,
                            level_start, n_frames, H, L, P, d_head)

    # output projection (tiled Pallas matmul)
    out = dense(out.reshape(N * Lq, C), params['out_w'], params['out_b']).reshape(N, Lq, C)
    return out


if __name__ == "__main__":
    d_model, n_frames, n_levels, n_heads, n_points = 32, 2, 2, 4, 2
    spatial_shapes = ((4, 4), (2, 2))          # (H_l, W_l) per level
    N = 2
    sum_hw = sum(h * w for h, w in spatial_shapes)
    Len_in = n_frames * sum_hw                 # 40
    Len_q = n_frames * sum_hw                  # 40

    key = jax.random.PRNGKey(0)
    kp, kq, kr, kf = jax.random.split(key, 4)
    params = init_params(kp, d_model, n_frames, n_levels, n_heads, n_points)
    query = jax.random.normal(kq, (N, Len_q, d_model), jnp.float32)
    reference_points = jax.random.uniform(kr, (N, Len_q, n_levels, 3), jnp.float32)
    input_flatten = jax.random.normal(kf, (N, Len_in, d_model), jnp.float32)

    out = ms_deform_attn_forward(params, query, reference_points, input_flatten,
                                 spatial_shapes, n_frames, n_levels, n_heads, n_points,
                                 core_impl="pallas")
    out = jax.block_until_ready(out)

    ref = ms_deform_attn_forward(params, query, reference_points, input_flatten,
                                 spatial_shapes, n_frames, n_levels, n_heads, n_points,
                                 core_impl="ref")
    # Pallas path uses bf16 value + bf16 MXU (f32 accumulate) -> loosened tolerance
    # vs. the all-f32 reference.
    np.testing.assert_allclose(np.asarray(out), np.asarray(ref), atol=2e-2, rtol=2e-2)
    print("KERNEL_OK")
</pallas_src>

<mosaic_0001>
module attributes {stable_mosaic.version = 11 : i64} {
  func.func @_dense_kernel(%arg0: i32, %arg1: memref<80x32xf32, #tpu.memory_space<vmem>>, %arg2: memref<32x32xf32, #tpu.memory_space<vmem>>, %arg3: memref<1x32xf32, #tpu.memory_space<vmem>>, %arg4: memref<80x32xbf16, #tpu.memory_space<vmem>>) attributes {dimension_semantics = [#tpu.dimension_semantics<parallel>], iteration_bounds = array<i64: 1>, scalar_prefetch = 0 : i64, scratch_operands = 0 : i64, tpu.core_type = #tpu.core_type<tc>, window_params = [{transform_indices = @transform_0, window_bounds = array<i64: 80, 32>}, {pipeline_mode = #tpu.pipeline_mode<synchronous>, transform_indices = @transform_1, window_bounds = array<i64: 32, 32>}, {pipeline_mode = #tpu.pipeline_mode<synchronous>, transform_indices = @transform_2, window_bounds = array<i64: 1, 32>}, {transform_indices = @transform_3, window_bounds = array<i64: 80, 32>}]} {
    %c0 = arith.constant 0 : index
    %c0_0 = arith.constant 0 : index
    %0 = vector.load %arg1[%c0, %c0_0] : memref<80x32xf32, #tpu.memory_space<vmem>>, vector<80x32xf32>
    %c0_1 = arith.constant 0 : index
    %c0_2 = arith.constant 0 : index
    %1 = vector.load %arg2[%c0_1, %c0_2] : memref<32x32xf32, #tpu.memory_space<vmem>>, vector<32x32xf32>
    %cst = arith.constant dense<0.000000e+00> : vector<80x32xf32>
    %2 = tpu.matmul %0, %1, %cst {dimension_numbers = #tpu.dot_dimension_numbers<[1], [0], [0], [1], [0, 0, 1, 1], [], []>} : vector<80x32xf32>, vector<32x32xf32>, vector<80x32xf32> -> vector<80x32xf32>
    %c0_3 = arith.constant 0 : index
    %c0_4 = arith.constant 0 : index
    %3 = vector.load %arg3[%c0_3, %c0_4] : memref<1x32xf32, #tpu.memory_space<vmem>>, vector<1x32xf32>
    %4 = vector.broadcast %3 : vector<1x32xf32> to vector<80x32xf32>
    %5 = arith.addf %2, %4 : vector<80x32xf32>
    %6 = arith.truncf %5 : vector<80x32xf32> to vector<80x32xbf16>
    %c0_5 = arith.constant 0 : index
    %c0_6 = arith.constant 0 : index
    %7 = vector.load %arg4[%c0_5, %c0_6] : memref<80x32xbf16, #tpu.memory_space<vmem>>, vector<80x32xbf16>
    tpu.vector_store %arg4[%c0_5, %c0_6], %6 {strides = array<i32>} : memref<80x32xbf16, #tpu.memory_space<vmem>>, vector<80x32xbf16>,
    return
  }
  func.func @transform_0(%arg0: i32) -> (i32, i32) {
    %c0_i32 = arith.constant 0 : i32
    %c0_i32_0 = arith.constant 0 : i32
    return %arg0, %c0_i32 : i32, i32
  }
  func.func @transform_1(%arg0: i32) -> (i32, i32) {
    %c0_i32 = arith.constant 0 : i32
    %c0_i32_0 = arith.constant 0 : i32
    %c0_i32_1 = arith.constant 0 : i32
    return %c0_i32, %c0_i32_0 : i32, i32
  }
  func.func @transform_2(%arg0: i32) -> (i32, i32) {
    %c0_i32 = arith.constant 0 : i32
    %c0_i32_0 = arith.constant 0 : i32
    %c0_i32_1 = arith.constant 0 : i32
    return %c0_i32, %c0_i32_0 : i32, i32
  }
  func.func @transform_3(%arg0: i32) -> (i32, i32) {
    %c0_i32 = arith.constant 0 : i32
    %c0_i32_0 = arith.constant 0 : i32
    return %arg0, %c0_i32 : i32, i32
  }
}

</mosaic_0001>

<bundles_post_ra>
// kernel: tpu_custom_call.1
= control target key start
LH: loop header
LB: loop body
LE: loop exit
PB: predicated region body
PF: predicated region fallthrough
CT: control target
= control target key end

     0   :  { %8 = vsyncpa [#allocation3], 0  ;;  %s575_s0 = inlined_call_operand.hbm [shape: f32[80,32], index: 0, kind: input, shape index: {}]   ;;  %s576_s1 = inlined_call_operand.hbm [shape: f32[32,32], index: 1, kind: input, shape index: {}]   ;;  %s577_s2 = inlined_call_operand.hbm [shape: f32[1,32], index: 2, kind: input, shape index: {}]   ;;  %s578_s3 = inlined_call_operand.hbm [shape: bf16[80,32], index: 3, kind: output, shape index: {}]  }
   0x1   :  { %9 = vsyncpa [#allocation6], 0 }
   0x2   :  { %10 = vsyncpa [#allocation4], 0  ;;  %s472_s12 = smov [#allocation5]   ;;  %s473_s14 = smov [#allocation2]  }
   0x3   :  { %s28_s13 = sshll.u32 %s472_s12, 4  ;;  %s16_s15 = sshll.u32 %s473_s14, 4  ;;  %s29_s13 = int_to_ptr.vmem [resolvable:$true] %s28_s13  ;;  %s500_s15 = int_to_ptr.vmem [resolvable:$true] %s16_s15 }
   0x4   :  { %s378_s18 = scalar_lea.hbm %s576_s1, 512 }
   0x5   :  { %p379_p0 = scmp.ne.s32.totalorder %s576_s1, %s378_s18  ;;  %p382_p1 = scmp.lt.u32.totalorder %s378_s18, %s576_s1 }
   0x7   :  { %p384_p2 = pnand %p382_p1, %p379_p0 }
   0x9   :  { %387 = shalt.err (!%p384_p2)
}
   0xa   :  { %s388_s23 = scalar_lea.vmem %s29_s13, 512  ;;  %p393_p4 = scmp.lt.s32.totalorder %s29_s13, %s29_s13 }
   0xb   :  { %p389_p3 = scmp.ne.s32.totalorder %s29_s13, %s388_s23  ;;  %p394_p5 = scmp.lt.s32.totalorder %s388_s23, %s388_s23 }
   0xd   :  { %p395_p6 = por %p394_p5, %p393_p4 }
   0xf   :  { %p396_p7 = pnand %p395_p6, %p389_p3 }
  0x11   :  { %399 = shalt.err (!%p396_p7)
}
  0x12   :  { %s474_s24 = smov 128   ;;  %s475_s25 = smov 8  }
  0x13   :  { %34 = dma.hbm_to_vmem [thread:$0]  %s576_s1, 512, %s29_s13, [#allocation6], %s474_s24, %s474_s24, %s475_s25  }
  0x14   :  { %s400_s30 = scalar_lea.hbm %s575_s0, 1280 }
  0x15   :  { %p401_p8 = scmp.ne.s32.totalorder %s575_s0, %s400_s30  ;;  %p404_p9 = scmp.lt.u32.totalorder %s400_s30, %s575_s0 }
  0x17   :  { %p406_p10 = pnand %p404_p9, %p401_p8 }
  0x19   :  { %409 = shalt.err (!%p406_p10)
}
  0x1a   :  { %s410_s8 = scalar_lea.vmem %s500_s15, 1280  ;;  %p415_p12 = scmp.lt.s32.totalorder %s500_s15, %s500_s15 }
  0x1b   :  { %p411_p11 = scmp.ne.s32.totalorder %s500_s15, %s410_s8  ;;  %p416_p13 = scmp.lt.s32.totalorder %s410_s8, %s410_s8 }
  0x1d   :  { %p417_p0 = por %p416_p13, %p415_p12 }
  0x1f   :  { %p418_p1 = pnand %p417_p0, %p411_p11 }
  0x21   :  { %421 = shalt.err (!%p418_p1)
}
  0x22   :  { %22 = dma.hbm_to_vmem [thread:$0]  %s575_s0, 1280, %s500_s15, [#allocation3], %s474_s24, %s474_s24, %s475_s25  }
  0x23   :  { %s476_s10 = smov [#allocation7]   ;;  %s422_s14 = scalar_lea.hbm %s577_s2, 16 }
  0x24   :  { %s41_s11 = sshll.u32 %s476_s10, 4  ;;  %p423_p2 = scmp.ne.s32.totalorder %s577_s2, %s422_s14  ;;  %s42_s11 = int_to_ptr.vmem [resolvable:$true] %s41_s11 }
  0x25   :  { %p426_p3 = scmp.lt.u32.totalorder %s422_s14, %s577_s2 }
  0x27   :  { %p428_p4 = pnand %p426_p3, %p423_p2 }
  0x29   :  { %431 = shalt.err (!%p428_p4)
}
  0x2a   :  { %s432_s20 = scalar_lea.vmem %s42_s11, 16  ;;  %s436_s0 = scalar_lea.vmem %s42_s11, 32 }
  0x2b   :  { %p433_p5 = scmp.ne.s32.totalorder %s42_s11, %s432_s20  ;;  %p437_p6 = scmp.lt.s32.totalorder %s42_s11, %s42_s11 }
  0x2c   :  { %p438_p7 = scmp.lt.s32.totalorder %s436_s0, %s432_s20 }
  0x2e   :  { %p439_p8 = por %p438_p7, %p437_p6 }
  0x30   :  { %p440_p9 = pnand %p439_p8, %p433_p5 }
  0x32   :  { %443 = shalt.err (!%p440_p9)
}
  0x33   :  { %44 = dma.hbm_to_vmem [thread:$0]  %s577_s2, 16, %s42_s11, [#allocation6]  }
  0x34   :  { %466 = dma.done.wait [#allocation3], 1280  }
  0x35   :  { %467 = vsyncadd [#allocation3], 4294966016 }
  0x36   :  { %468 = dma.done.wait [#allocation6], 528  }
  0x37   :  { %469 = vsyncadd [#allocation6], 4294966768  ;;  %vm75_vm0 = vcmask 261120   ;;  %v64_v0 = vld [vmem:[#allocation5] sm:$0xff]  ;;  %v65_v1 = vld [vmem:[#allocation5 + $0x8] sm:$0xff]  ;;  %vm261_vm1 = vcmask 257024  }
  0x38   :  { %v66_v2 = vld [vmem:[#allocation5 + $0x10] sm:$0xff]  ;;  %v358_v3 = vpack.c.bf16 %v65_v1, %v64_v0  ;;  %v67_v4 = vld [vmem:[#allocation5 + $0x18] sm:$0xff]  ;;  %v60_v7 = vld [vmem:[#allocation2 + $0x30] sm:$0xff]  ;;  %s477_s2 = smov [#allocation8]  }
  0x39   :  { %v54_v5 = vld [vmem:[#allocation2] sm:$0xff]  ;;  %v362_v6 = vpack.c.bf16 %v67_v4, %v66_v2  ;;  %352 = vmatprep.mubr.msk.f32.mxu1 %vm75_vm0, %v60_v7  ;;  %v55_v8 = vld [vmem:[#allocation2 + $0x8] sm:$0xff]  ;;  %v61_v9 = vld [vmem:[#allocation2 + $0x38] sm:$0xff]  ;;  %s277_s22 = sshll.u32 %s477_s2, 4  ;;  %s278_s22 = int_to_ptr.vmem [resolvable:$true] %s277_s22 }
  0x3a   :  { %343 = vmatprep.mubr.msk.f32.mxu0 %vm75_vm0, %v54_v5  ;;  %359 = vmatprep.subr.bf16.mxu0 %v358_v3  ;;  %v56_v10 = vld [vmem:[#allocation2 + $0x10] sm:$0xff]  ;;  %v62_v11 = vld [vmem:[#allocation2 + $0x40] sm:$0xff]  ;;  %v57_v12 = vld [vmem:[#allocation2 + $0x18] sm:$0xff]  ;;  %s444_s23 = scalar_lea.vmem %s278_s22, 640  ;;  %p449_p11 = scmp.lt.s32.totalorder %s278_s22, %s278_s22 }
  0x3b   :  { %366 = vmatprep.subr.bf16.mxu1 %v358_v3  ;;  %361 = vmatpush3.bf16.msra.mxu0 %v358_v3  ;;  %v63_v13 = vld [vmem:[#allocation2 + $0x48] sm:$0xff]  ;;  %v58_v14 = vld [vmem:[#allocation2 + $0x20] sm:$0xff]  ;;  %v290_v16 = vld [vmem:[#allocation7] ss:$0 sm:$0xff]  ;;  %p445_p10 = scmp.ne.s32.totalorder %s278_s22, %s444_s23  ;;  %p450_p12 = scmp.lt.s32.totalorder %s444_s23, %s444_s23 }
  0x3c   :  { %368 = vmatpush3.bf16.msra.mxu1 %v358_v3  ;;  %363 = vmatprep.subr.bf16.mxu0 %v362_v6  ;;  %v59_v15 = vld [vmem:[#allocation2 + $0x28] sm:$0xff] }
  0x3d   :  { %367 = vmatprep.subr.bf16.mxu1 %v362_v6  ;;  %p451_p13 = por %p450_p12, %p449_p11 }
  0x3f   :  { %365 = vmatpush3.bf16.msra.mxu0 %v362_v6  ;;  %p452_p0 = pnand %p451_p13, %p445_p10 }
  0x40   :  { %369 = vmatpush3.bf16.msra.mxu1 %v362_v6 }
  0x42   :  { %344 = vmatmul.mubr.msk.f32.vlgmr.msra.gmra.mrb[0].mxu0 %vm75_vm0, %v55_v8 }
  0x43   :  { %353 = vmatmul.mubr.msk.f32.vlgmr.msra.gmra.mrb[0].mxu1 %vm75_vm0, %v61_v9  ;;  %346 = vmatprep.mubr.msk.f32.mxu0 %vm75_vm0, %v56_v10 }
  0x44   :  { %355 = vmatprep.mubr.msk.f32.mxu1 %vm75_vm0, %v62_v11 }
  0x46   :  { %347 = vmatmul.mubr.msk.f32.gmra.mrb[2].mxu0 %vm75_vm0, %v57_v12 }
  0x47   :  { %356 = vmatmul.mubr.msk.f32.gmra.mrb[2].mxu1 %vm75_vm0, %v63_v13  ;;  %349 = vmatprep.mubr.msk.f32.mxu0 %vm75_vm0, %v58_v14 }
  0x4a   :  { %350 = vmatmul.mubr.msk.f32.gmra.mrb[4].mxu0 %vm75_vm0, %v59_v15 }
 0x115   :  { %v345_v17 = vpop.f32.mrb[0].mxu0 }
 0x116   :  { %v354_v18 = vpop.f32.mrb[0].mxu1  ;;  %v178_v19 = vadd.f32 %v345_v17, %v290_v16  ;;  %v172_v20 = vpop.f32.mrb[1].mxu0 }
 0x117   :  { %v208_v21 = vadd.f32 %v354_v18, %v290_v16  ;;  %v202_v22 = vpop.f32.mrb[1].mxu1  ;;  %v173_v23 = vadd.f32 %v290_v16, %v172_v20 }
 0x118   :  { %v203_v24 = vadd.f32 %v290_v16, %v202_v22  ;;  %v312_v25 = vpack.c.bf16 %v178_v19, %v178_v19 }
 0x119   :  { %v318_v26 = vpack.c.bf16 %v208_v21, %v208_v21  ;;  %v311_v27 = vpack.c.bf16 %v173_v23, %v173_v23  ;;  %v348_v28 = vpop.f32.mrb[2].mxu0 }
 0x11a   :  { %v317_v29 = vpack.c.bf16 %v203_v24, %v203_v24  ;;  %v357_v30 = vpop.f32.mrb[2].mxu1  ;;  %263 = vst.msk [vmem:[#allocation8 + $0x4] sm:$0xf] %vm261_vm1, %v312_v25  ;;  %v188_v31 = vadd.f32 %v348_v28, %v290_v16  ;;  %v182_v32 = vpop.f32.mrb[3].mxu0 }
 0x11b   :  { %269 = vst.msk [vmem:[#allocation8 + $0x1c] sm:$0xf] %vm261_vm1, %v318_v26  ;;  %v218_v33 = vadd.f32 %v357_v30, %v290_v16  ;;  %v212_v34 = vpop.f32.mrb[3].mxu1  ;;  %262 = vst.msk [vmem:[#allocation8] sm:$0xf] %vm261_vm1, %v311_v27  ;;  %v183_v35 = vadd.f32 %v290_v16, %v182_v32 }
 0x11c   :  { %268 = vst.msk [vmem:[#allocation8 + $0x18] sm:$0xf] %vm261_vm1, %v317_v29  ;;  %v213_v36 = vadd.f32 %v290_v16, %v212_v34  ;;  %v314_v37 = vpack.c.bf16 %v188_v31, %v188_v31 }
 0x11d   :  { %v320_v38 = vpack.c.bf16 %v218_v33, %v218_v33  ;;  %v313_v39 = vpack.c.bf16 %v183_v35, %v183_v35  ;;  %v351_v40 = vpop.f32.mrb[4].mxu0 }
 0x11e   :  { %v319_v41 = vpack.c.bf16 %v213_v36, %v213_v36  ;;  %265 = vst.msk [vmem:[#allocation8 + $0xc] sm:$0xf] %vm261_vm1, %v314_v37  ;;  %v198_v42 = vadd.f32 %v351_v40, %v290_v16  ;;  %v192_v43 = vpop.f32.mrb[5].mxu0 }
 0x11f   :  { %271 = vst.msk [vmem:[#allocation8 + $0x24] sm:$0xf] %vm261_vm1, %v320_v38  ;;  %264 = vst.msk [vmem:[#allocation8 + $0x8] sm:$0xf] %vm261_vm1, %v313_v39  ;;  %v193_v44 = vadd.f32 %v290_v16, %v192_v43 }
 0x120   :  { %270 = vst.msk [vmem:[#allocation8 + $0x20] sm:$0xf] %vm261_vm1, %v319_v41  ;;  %v316_v45 = vpack.c.bf16 %v198_v42, %v198_v42 }
 0x121   :  { %v315_v46 = vpack.c.bf16 %v193_v44, %v193_v44 }
 0x122   :  { %267 = vst.msk [vmem:[#allocation8 + $0x14] sm:$0xf] %vm261_vm1, %v316_v45 }
 0x123   :  { %266 = vst.msk [vmem:[#allocation8 + $0x10] sm:$0xf] %vm261_vm1, %v315_v46 }
 0x124   :  { %455 = shalt.err (!%p452_p0)
}
 0x125   :  { %s456_s26 = scalar_lea.hbm %s578_s3, 640 }
 0x126   :  { %p457_p1 = scmp.ne.s32.totalorder %s578_s3, %s456_s26  ;;  %p460_p2 = scmp.lt.u32.totalorder %s456_s26, %s578_s3 }
 0x128   :  { %p462_p3 = pnand %p460_p2, %p457_p1 }
 0x12a   :  { %465 = shalt.err (!%p462_p3)
}
 0x12b   :  { %s478_s4 = smov 64   ;;  %s479_s5 = smov 4  }
 0x12c   :  { %283 = dma.vmem_to_hbm [thread:$0]  %s278_s22, 640, %s578_s3, [#allocation4], %s478_s4, %s478_s4, %s479_s5  }
 0x12d   :  { %470 = dma.done.wait [#allocation4], 640  }
 0x12e   :  { %471 = vsyncadd [#allocation4], 4294966656 }
 0x12f   :  { %287 = vsyncpa [#allocation3], 1 }
 0x130   :  { %288 = vsyncpa [#allocation6], 1 }
 0x131   :  { %289 = vsyncpa [#allocation4], 1 }

</bundles_post_ra>
